<compile_context>
chip_gen: v6e
topology: v6e:2x2x1
jax: 0.10.0
libtpu: 0.0.40
codegen_flags: <defaults>
</compile_context>

<pallas_src>
import functools

import jax
import jax.numpy as jnp
import numpy as np
from jax.experimental import pallas as pl
from jax.experimental.pallas import tpu as pltpu


_ACTS = ("lrelu", "lrelu", "lrelu", "relu", "tanh")      # per-conv activation
_NUM_CONVS = len(_ACTS)
_CIN_PAD = 8                                             # pad 3 input channels to 8 sublanes


# --------------------------- pltpu.roll direction probe ----------------------

@functools.lru_cache(maxsize=None)
def _roll_matches_numpy():
    """One-off tiny kernel: does pltpu.roll follow np.roll's shift direction?"""
    def k(x_ref, o_ref):
        o_ref[...] = pltpu.roll(x_ref[...], shift=1, axis=1)

    x = np.arange(2 * 128, dtype=np.float32).reshape(2, 128)
    y = np.asarray(pl.pallas_call(
        k, out_shape=jax.ShapeDtypeStruct((2, 128), jnp.float32))(jnp.asarray(x)))
    return bool(np.array_equal(y, np.roll(x, 1, axis=1)))


# ------------------------------- fused kernel --------------------------------

def _make_kernel(height, width, roll_like_numpy):
    h2, w2 = height // 2, width // 2
    h4, w4 = height // 4, width // 4

    def kernel(key_ref, x_ref, *refs):
        # refs = 5 x (w_packed, scale_tbl, bias_tbl) + (sub1, sub2, up1, up2, pool, fcw, fcb)
        #        + (g_out, d_out)
        conv_refs = [refs[3 * i: 3 * i + 3] for i in range(_NUM_CONVS)]
        (sub1_ref, sub2_ref, up1_ref, up2_ref, pool_ref,
         fcw_ref, fcb_ref, g_ref, d_ref) = refs[3 * _NUM_CONVS:]

        n_steps = conv_refs[0][1].shape[1]
        key = jnp.clip(key_ref[0], 0, n_steps - 1)       # guard against out-of-range enc_key
        onehot = (jax.lax.broadcasted_iota(jnp.int32, (n_steps, 1), 0) == key
                  ).astype(jnp.float32)

        def affine_act(y, idx):
            # conditional scale/bias (conv bias folded into the bias table at prep time)
            _, s_ref, b_ref = conv_refs[idx]
            scale = jnp.dot(s_ref[...], onehot, preferred_element_type=jnp.float32)
            shift = jnp.dot(b_ref[...], onehot, preferred_element_type=jnp.float32)
            y = y * scale + shift
            act = _ACTS[idx]
            if act == "lrelu":
                return jnp.where(y > 0, y, 0.2 * y)
            if act == "relu":
                return jnp.maximum(y, 0.0)
            return jnp.tanh(y)

        def conv3x3(a, idx, hh, ww):
            """3x3 stride-1 conv (zero pad=1) on lane-flat (Cin, B*hh*ww [+lane pad]) data.

            Each tap is an XLU lane roll + VPU boundary mask; the 9 taps are stacked along
            the contraction axis and mixed with one bf16 MXU matmul.
            """
            w_ref = conv_refs[idx][0]                    # (Cout, 9*Cin) bf16
            n = a.shape[-1]
            lane = jax.lax.broadcasted_iota(jnp.int32, (1, n), 1)
            hi = (lane // ww) % hh
            wi = lane % ww
            taps = []
            for ki in range(3):
                for kj in range(3):
                    dh, dw = ki - 1, kj - 1
                    delta = dh * ww + dw
                    if delta == 0:
                        t = a
                    else:
                        sh = (-delta) % n if roll_like_numpy else delta % n
                        t = pltpu.roll(a, shift=sh, axis=1)
                    ok = ((hi + dh >= 0) & (hi + dh < hh) &
                          (wi + dw >= 0) & (wi + dw < ww)).astype(jnp.float32)
                    taps.append(t * ok)
            stacked = jnp.concatenate(taps, axis=0).astype(jnp.bfloat16)   # (9*Cin, n)
            return jnp.dot(w_ref[...], stacked, preferred_element_type=jnp.float32)

        def mm(a, b_ref):                                # bf16 MXU matmul, f32 accumulation
            return jnp.dot(a.astype(jnp.bfloat16), b_ref[...],
                           preferred_element_type=jnp.float32)

        # -------- Encoder (stride-2 conv == stride-1 conv + one subsample matmul) --------
        e1 = affine_act(mm(conv3x3(x_ref[...], 0, height, width), sub1_ref), 0)   # (16, N1)
        e = affine_act(mm(conv3x3(e1, 1, h2, w2), sub2_ref), 1)                   # (32, 128pad)

        # -------- Discriminator: conv + GAP + linear, fused --------
        # TODO(synk): original Discriminator takes scalebias_per_step at __init__ but its
        # forward receives no key, so no conditional scale/bias is applied here.
        hd = affine_act(conv3x3(e, 2, h4, w4), 2)                                  # (32, 128pad)
        pooled = mm(hd, pool_ref)                                                  # (32, 128)
        d = jnp.dot(fcw_ref[...], pooled.astype(jnp.bfloat16),
                    preferred_element_type=jnp.float32) + fcb_ref[...]             # (1, 128)
        d_ref[...] = jnp.broadcast_to(d, d_ref.shape)

        # -------- Generator: 2x nearest upsample == one replication matmul, then rolls ----
        gh = affine_act(conv3x3(mm(e, up1_ref), 3, h2, w2), 3)                     # (16, N1)
        g_ref[...] = affine_act(conv3x3(mm(gh, up2_ref), 4, height, width), 4)     # (3, N0)

    return kernel


# ------------------------------- parameters ----------------------------------

def init_params(key, scalebias_per_step):
    """PyTorch-like parameter structure (same reconstruction as before)."""
    ks = jax.random.split(key, 9)

    def conv_p(k, cin, cout):
        kw_, kb_ = jax.random.split(k)
        return {"w": 0.1 * jax.random.normal(kw_, (cout, cin, 3, 3), jnp.float32),
                "b": 0.1 * jax.random.normal(kb_, (cout,), jnp.float32)}

    def cond_p(k, cout):
        ks_, kb_ = jax.random.split(k)
        return {"scale": 1.0 + 0.1 * jax.random.normal(
                    ks_, (scalebias_per_step, cout), jnp.float32),
                "bias": 0.1 * jax.random.normal(
                    kb_, (scalebias_per_step, cout), jnp.float32)}

    return {
        "enc_conv1": conv_p(ks[0], 3, 16),  "enc_cond1": cond_p(ks[1], 16),
        "enc_conv2": conv_p(ks[2], 16, 32), "enc_cond2": cond_p(ks[3], 32),
        "disc_conv": conv_p(ks[4], 32, 32),
        "disc_fc_w": 0.1 * jax.random.normal(ks[5], (32, 1), jnp.float32),
        "disc_fc_b": jnp.zeros((1,), jnp.float32),
        "gen_conv1": conv_p(ks[6], 32, 16), "gen_cond1": cond_p(ks[7], 16),
        "gen_conv2": conv_p(ks[8], 16, 3),
    }


def pack_operands(params, batch_block, height, width, scalebias_per_step):
    """Precompute (once, per batch-block) every constant operand of the fused kernel."""
    s = scalebias_per_step
    h2, w2, h4, w4 = height // 2, width // 2, height // 4, width // 4
    n0 = batch_block * height * width
    n1 = batch_block * h2 * w2
    n2 = batch_block * h4 * w4
    npad = max(128, -(-n2 // 128) * 128)                 # padded "e" lane width (roll-friendly)
    dpad = 128                                            # padded lane width of disc output

    def w_packed(w, cin_pad=None):                        # (Cout,Cin,3,3) -> (Cout, 9*Cin_eff)
        w_np = np.asarray(w, np.float32)
        cout, cin = w_np.shape[0], w_np.shape[1]
        cin_eff = cin if cin_pad is None else cin_pad
        wp = np.zeros((cout, 9 * cin_eff), np.float32)
        for ki in range(3):
            for kj in range(3):
                t = ki * 3 + kj
                wp[:, t * cin_eff: t * cin_eff + cin] = w_np[:, :, ki, kj]
        return jnp.asarray(wp, jnp.bfloat16)

    def affine_tables(conv_b, cond):
        # Fold conv bias: (y + b)*scale + bias == y*scale + (b*scale + bias)
        cout = conv_b.shape[0]
        if cond is None:
            scale_t = jnp.ones((cout, s), jnp.float32)
            bias_t = jnp.broadcast_to(conv_b[:, None], (cout, s)).astype(jnp.float32)
        else:
            scale_t = cond["scale"].T.astype(jnp.float32)
            bias_t = (conv_b[None, :] * cond["scale"] + cond["bias"]).T.astype(jnp.float32)
        return scale_t, bias_t

    def flat(b, h, w, hh, ww):
        return (b * hh + h) * ww + w

    sub1 = np.zeros((n0, n1), np.float32)                 # stride-2 subsample, res0 -> res1
    sub2 = np.zeros((n1, npad), np.float32)               # stride-2 subsample, res1 -> padded res2
    up1 = np.zeros((npad, n1), np.float32)                # 2x nearest upsample, res2 -> res1
    up2 = np.zeros((n1, n0), np.float32)                  # 2x nearest upsample, res1 -> res0
    pool = np.zeros((npad, dpad), np.float32)             # global average pool -> per-image lane
    for b in range(batch_block):
        for ho in range(h2):
            for wo in range(w2):
                sub1[flat(b, 2 * ho, 2 * wo, height, width), flat(b, ho, wo, h2, w2)] = 1.0
                up1[flat(b, ho // 2, wo // 2, h4, w4), flat(b, ho, wo, h2, w2)] = 1.0
        for ho in range(h4):
            for wo in range(w4):
                sub2[flat(b, 2 * ho, 2 * wo, h2, w2), flat(b, ho, wo, h4, w4)] = 1.0
                pool[flat(b, ho, wo, h4, w4), b] = 1.0 / float(h4 * w4)
        for ho in range(height):
            for wo in range(width):
                up2[flat(b, ho // 2, wo // 2, h2, w2), flat(b, ho, wo, height, width)] = 1.0

    layers = [
        (params["enc_conv1"], params["enc_cond1"], _CIN_PAD),
        (params["enc_conv2"], params["enc_cond2"], None),
        (params["disc_conv"], None, None),
        (params["gen_conv1"], params["gen_cond1"], None),
        (params["gen_conv2"], None, None),
    ]
    ops = []
    for conv_p, cond_p, cin_pad in layers:
        st, bt = affine_tables(conv_p["b"], cond_p)
        ops += [w_packed(conv_p["w"], cin_pad), st, bt]
    ops += [jnp.asarray(m, jnp.bfloat16) for m in (sub1, sub2, up1, up2, pool)]
    ops += [params["disc_fc_w"].T.astype(jnp.bfloat16),               # (1, 32)
            params["disc_fc_b"].reshape(1, 1).astype(jnp.float32)]    # (1, 1)
    return ops


# ------------------------------ model forward --------------------------------

def build_forward(params, *, batch, height, width, scalebias_per_step, batch_block=None):
    """Returns forward(x, enc_key) -> (g, d) implemented as a single pallas_call."""
    if batch_block is None:
        batch_block = batch
    assert batch % batch_block == 0
    assert height % 4 == 0 and width % 4 == 0
    nblk = batch // batch_block
    n0b = batch_block * height * width
    n1b = batch_block * (height // 2) * (width // 2)
    assert n0b % 128 == 0 and n1b % 128 == 0, (
        "per-batch-block flattened spatial dims must be multiples of 128 lanes")
    dpad = 128

    operands = pack_operands(params, batch_block, height, width, scalebias_per_step)
    kernel = _make_kernel(height, width, _roll_matches_numpy())

    grid_spec = pltpu.PrefetchScalarGridSpec(
        num_scalar_prefetch=1,
        grid=(nblk,),
        in_specs=[pl.BlockSpec((_CIN_PAD, n0b), lambda i, k: (0, i))] +
                 [pl.BlockSpec(op.shape, lambda i, k: (0, 0)) for op in operands],
        out_specs=(pl.BlockSpec((3, n0b), lambda i, k: (0, i)),
                   pl.BlockSpec((8, dpad), lambda i, k: (0, i))),
    )
    call = pl.pallas_call(
        kernel,
        out_shape=(jax.ShapeDtypeStruct((3, batch * height * width), jnp.float32),
                   jax.ShapeDtypeStruct((8, nblk * dpad), jnp.float32)),
        grid_spec=grid_spec,
        compiler_params=pltpu.CompilerParams(dimension_semantics=("parallel",)),
    )

    def forward(x, enc_key):
        b, cin, hgt, wid = x.shape
        # Lane-dense layout: channels on sublanes (padded 3->8), flattened B*H*W on lanes.
        x_flat = jnp.transpose(x, (1, 0, 2, 3)).reshape(cin, b * hgt * wid)
        x_pad = jnp.concatenate(
            [x_flat, jnp.zeros((_CIN_PAD - cin, b * hgt * wid), x_flat.dtype)], axis=0)
        key_arr = jnp.reshape(jnp.asarray(enc_key, jnp.int32), (1,))
        g_flat, d_pad = call(key_arr, x_pad, *operands)
        g = jnp.transpose(g_flat.reshape(3, b, hgt, wid), (1, 0, 2, 3))
        d = d_pad[0].reshape(nblk, dpad)[:, :batch_block].reshape(b, 1)
        return g, d

    return forward


# --------------------------- pure-JAX reference ------------------------------

def reference_forward(params, x, enc_key):
    """Pure-JAX reference of the same reconstruction (correctness check only)."""
    hp = jax.lax.Precision.HIGHEST

    def conv(v, w, b, stride):
        y = jax.lax.conv_general_dilated(
            v, w, window_strides=(stride, stride), padding=((1, 1), (1, 1)),
            dimension_numbers=("NCHW", "OIHW", "NCHW"), precision=hp)
        return y + b[None, :, None, None]

    def cond(y, tbl, k):
        return (y * tbl["scale"][k][None, :, None, None]
                + tbl["bias"][k][None, :, None, None])

    lrelu = lambda v: jnp.where(v > 0, v, 0.2 * v)
    up2 = lambda v: jnp.repeat(jnp.repeat(v, 2, axis=2), 2, axis=3)

    p = params
    e = lrelu(cond(conv(x, p["enc_conv1"]["w"], p["enc_conv1"]["b"], 2),
                   p["enc_cond1"], enc_key))
    e = lrelu(cond(conv(e, p["enc_conv2"]["w"], p["enc_conv2"]["b"], 2),
                   p["enc_cond2"], enc_key))
    h = lrelu(conv(e, p["disc_conv"]["w"], p["disc_conv"]["b"], 1))
    d = jnp.matmul(jnp.mean(h, axis=(2, 3)), p["disc_fc_w"],
                   precision=hp) + p["disc_fc_b"]
    hg = jnp.maximum(cond(conv(up2(e), p["gen_conv1"]["w"], p["gen_conv1"]["b"], 1),
                          p["gen_cond1"], enc_key), 0.0)
    g = jnp.tanh(conv(up2(hg), p["gen_conv2"]["w"], p["gen_conv2"]["b"], 1))
    return g, d


# ----------------------------------- main ------------------------------------

if __name__ == "__main__":
    root = jax.random.PRNGKey(0)
    kp, kx = jax.random.split(root)

    scalebias_per_step = 4
    batch, height, width = 4, 16, 16
    batch_block = 2        # grid=(2,) "parallel" batch blocks (v7x can split across its 2 TCs)

    params = init_params(kp, scalebias_per_step)
    fwd = jax.jit(build_forward(params, batch=batch, height=height, width=width,
                                scalebias_per_step=scalebias_per_step,
                                batch_block=batch_block))

    x = jax.random.normal(kx, (batch, 3, height, width), jnp.float32)   # NCHW
    enc_key = jnp.asarray(2, jnp.int32)        # step index < scalebias_per_step

    g, d = fwd(x, enc_key)
    jax.block_until_ready((g, d))

    assert g.shape == (batch, 3, height, width) and g.dtype == jnp.float32
    assert d.shape == (batch, 1) and d.dtype == jnp.float32

    # Numerical check against the pure-JAX reference.  Tolerance is deliberately loose
    # (2e-2) because the kernel's matmul operands are cast to bf16 (f32 accumulation).
    g_ref, d_ref = reference_forward(params, x, enc_key)
    np.testing.assert_allclose(np.asarray(g), np.asarray(g_ref), rtol=2e-2, atol=2e-2)
    np.testing.assert_allclose(np.asarray(d), np.asarray(d_ref), rtol=2e-2, atol=2e-2)

    print("KERNEL_OK")
</pallas_src>

<mosaic_0001>
module attributes {stable_mosaic.version = 11 : i64} {
  func.func @k(%arg0: memref<2x128xf32, #tpu.memory_space<vmem>>, %arg1: memref<2x128xf32, #tpu.memory_space<vmem>>) attributes {dimension_semantics = [], scalar_prefetch = 0 : i64, scratch_operands = 0 : i64, tpu.core_type = #tpu.core_type<tc>} {
    %c0 = arith.constant 0 : index
    %c0_0 = arith.constant 0 : index
    %0 = vector.load %arg0[%c0, %c0_0] : memref<2x128xf32, #tpu.memory_space<vmem>>, vector<2x128xf32>
    %c1_i32 = arith.constant 1 : i32
    %1 = tpu.dynamic_rotate %0 by %c1_i32 dim 1 : vector<2x128xf32>, i32 -> vector<2x128xf32>
    %c0_1 = arith.constant 0 : index
    %c0_2 = arith.constant 0 : index
    %2 = vector.load %arg1[%c0_1, %c0_2] : memref<2x128xf32, #tpu.memory_space<vmem>>, vector<2x128xf32>
    tpu.vector_store %arg1[%c0_1, %c0_2], %1 {strides = array<i32>} : memref<2x128xf32, #tpu.memory_space<vmem>>, vector<2x128xf32>,
    return
  }
}

</mosaic_0001>

<bundles_post_ra>
// kernel: tpu_custom_call.1
= control target key start
LH: loop header
LB: loop body
LE: loop exit
PB: predicated region body
PF: predicated region fallthrough
CT: control target
= control target key end

     0   :  { %6 = vsyncpa [#allocation3], 0  ;;  %s106_s0 = inlined_call_operand.hbm [shape: f32[2,128], index: 0, kind: input, shape index: {}]   ;;  %s107_s1 = inlined_call_operand.hbm [shape: f32[2,128], index: 1, kind: output, shape index: {}]  }
   0x1   :  { %7 = vsyncpa [#allocation4], 0  ;;  %s87_s6 = smov [#allocation2]  }
   0x2   :  { %s14_s7 = sshll.u32 %s87_s6, 4  ;;  %s15_s7 = int_to_ptr.vmem [resolvable:$true] %s14_s7 }
   0x3   :  { %s51_s8 = scalar_lea.vmem %s15_s7, 32  ;;  %p56_p1 = scmp.lt.s32.totalorder %s15_s7, %s15_s7 }
   0x4   :  { %p52_p0 = scmp.ne.s32.totalorder %s15_s7, %s51_s8  ;;  %p57_p2 = scmp.lt.s32.totalorder %s51_s8, %s51_s8 }
   0x6   :  { %p58_p3 = por %p57_p2, %p56_p1 }
   0x8   :  { %p59_p4 = pnand %p58_p3, %p52_p0 }
   0xa   :  { %62 = shalt.err (!%p59_p4)
}
   0xb   :  { %17 = dma.hbm_to_vmem [thread:$0]  %s106_s0, 32, %s15_s7, [#allocation3]  }
   0xc   :  { %83 = dma.done.wait [#allocation3], 32  }
   0xd   :  { %84 = vsyncadd [#allocation3], 4294967264  ;;  %v21_v0 = vld [vmem:[#allocation2] sm:$0x3]  ;;  %s88_s11 = smov 1   ;;  %s89_s12 = smov [#allocation5]  }
   0xe   :  { %22 = vrot.lane.b32.xlu0 %v21_v0, %s88_s11  ;;  %s31_s13 = sshll.u32 %s89_s12, 4  ;;  %s32_s13 = int_to_ptr.vmem [resolvable:$true] %s31_s13 }
   0xf   :  { %s63_s14 = scalar_lea.vmem %s32_s13, 32  ;;  %p68_p6 = scmp.lt.s32.totalorder %s32_s13, %s32_s13 }
  0x10   :  { %p64_p5 = scmp.ne.s32.totalorder %s32_s13, %s63_s14  ;;  %p69_p7 = scmp.lt.s32.totalorder %s63_s14, %s63_s14 }
  0x12   :  { %p70_p8 = por %p69_p7, %p68_p6 }
  0x14   :  { %p71_p9 = pnand %p70_p8, %p64_p5 }
  0x80   :  { %v23_v1 = vpop.permute.xlu0 %22 }
  0x81   :  { %24 = vst [vmem:[#allocation5] sm:$0x3] %v23_v1 }
  0x82   :  { %74 = shalt.err (!%p71_p9)
}
  0x83   :  { %34 = dma.vmem_to_hbm [thread:$0]  %s32_s13, 32, %s107_s1, [#allocation4]  }
  0x84   :  { %85 = dma.done.wait [#allocation4], 32  }
  0x85   :  { %86 = vsyncadd [#allocation4], 4294967264 }
  0x86   :  { %38 = vsyncpa [#allocation3], 1 }
  0x87   :  { %39 = vsyncpa [#allocation4], 1 }

</bundles_post_ra>
